<compile_context>
chip_gen: v7x
topology: tpu7x:2x2x1
jax: 0.10.0
libtpu: 0.0.40
codegen_flags: <defaults>
</compile_context>

<pallas_src>
import math
import jax
import jax.numpy as jnp
from jax import lax
from jax.experimental import pallas as pl
from jax.experimental.pallas import tpu as pltpu


def _round_up(n, m):
    return ((n + m - 1) // m) * m


def _mlp_kernel(*refs):
    """Fused MLP; activations kept as (features, batch_tile): batch on lanes.

    refs = (x_ref, w0_ref, b0_ref, w1_ref, b1_ref, ..., o_ref)
      x_ref : (block_batch, in_dim)   batch-major tile straight from HBM
      wi    : (out_i, in_i)           PyTorch nn.Linear layout (resident)
      bi    : (out_i, 1)
      o_ref : (out_dim, block_batch)  lane-dense output tile
    """
    *in_refs, o_ref = refs
    x_ref = in_refs[0]
    param_refs = in_refs[1:]
    n_layers = len(param_refs) // 2

    # Layer 0: h = W0 @ x_tile^T + b0 as a transposed-rhs MXU matmul
    # (identical dimension numbers to pl.dot(..., trans_b=True)).  No host or
    # XLU transpose of x; Mosaic zero-pads the K=3 contraction.
    w0 = param_refs[0][...].astype(jnp.float32)            # (out0, in_dim)
    b0 = param_refs[1][...].astype(jnp.float32)            # (out0, 1)
    h = lax.dot_general(
        w0, x_ref[...].astype(jnp.float32),
        dimension_numbers=(((1,), (1,)), ((), ())),
        preferred_element_type=jnp.float32,
    ) + b0                                                  # (out0, B)
    if n_layers > 1:
        h = jnp.maximum(h, 0.0)                             # ReLU (VPU)

    # Remaining layers: plain MXU matmuls on the (feat, B) layout.
    for i in range(1, n_layers):
        w = param_refs[2 * i][...].astype(jnp.float32)      # (out, in)
        b = param_refs[2 * i + 1][...].astype(jnp.float32)  # (out, 1)
        h = jnp.dot(w, h, preferred_element_type=jnp.float32) + b
        if i < n_layers - 1:
            h = jnp.maximum(h, 0.0)

    # Sigmoid: exp on the EUP, exact reciprocal (keeps 1e-5 parity; exp
    # overflow -> inf -> 1/inf = 0 is the correct limit).
    h = pl.reciprocal(1.0 + jnp.exp(-h), approx=False)
    o_ref[...] = h.astype(o_ref.dtype)


def mlp_forward(x, params, *, max_block_batch=4096):
    """x: (batch, in_dim) f32.  params: list of (W (out,in), b (out,1)) — PyTorch layout."""
    batch, in_dim = x.shape
    out_dim = params[-1][0].shape[0]
    widest = max(w.shape[0] for w, _ in params)

    # ---- batch-tile selection ------------------------------------------------
    # Per-batch-element VMEM bytes: double-buffered x tile rows (lane-padded to
    # 128), double-buffered output tile rows, ~3 live f32 activation columns.
    # Keep the working set under ~12 MiB so no vmem_limit_bytes is needed even
    # with v5e's 16 MiB default scoped VMEM (and well clear of v7x's 64 MiB).
    per_elem = (2 * _round_up(in_dim, 128) * 4
                + 2 * _round_up(out_dim, 8) * 4
                + 3 * widest * 4)
    vmem_budget = 12 * 1024 * 1024
    vmem_cap = max(128, ((vmem_budget // per_elem) // 128) * 128)
    block_batch = max(128, (min(max_block_batch, vmem_cap) // 128) * 128)

    lanes = _round_up(batch, 128)
    # At least 2 grid steps, rounded to an even count, so ("parallel",) can
    # split the batch across both TensorCores on v7x (harmless on v5e/v6e).
    steps = max(2, pl.cdiv(lanes, block_batch))
    steps += steps % 2
    block_batch = min(block_batch, _round_up(pl.cdiv(lanes, steps), 128))
    padded_batch = steps * block_batch

    # x is read batch-major, directly from HBM.  Grid steps whose tile would
    # start past the real batch are clamped onto the last valid block; their
    # duplicate outputs land in padded columns that are sliced away below.
    n_valid = pl.cdiv(batch, block_batch)

    flat_params = []
    in_specs = [pl.BlockSpec((block_batch, in_dim),
                             lambda i: (jnp.minimum(i, n_valid - 1), 0))]
    for w, b in params:
        flat_params += [w, b]
        # Grid-invariant, fully resident weights/biases (a few KiB total).
        in_specs.append(pl.BlockSpec(w.shape, lambda i: (0, 0)))
        in_specs.append(pl.BlockSpec(b.shape, lambda i: (0, 0)))
    out_spec = pl.BlockSpec((out_dim, block_batch), lambda i: (0, i))

    # Advisory cost estimate so XLA schedules this tiny custom call sanely.
    flops = int(sum(2 * w.shape[0] * w.shape[1] * padded_batch for w, _ in params))
    bytes_accessed = int(4 * (batch * in_dim
                              + sum(w.size + b.size for w, b in params)
                              + out_dim * padded_batch))
    cost = pl.CostEstimate(flops=flops,
                           transcendentals=int(out_dim * padded_batch),
                           bytes_accessed=bytes_accessed)

    out_t = pl.pallas_call(
        _mlp_kernel,
        out_shape=jax.ShapeDtypeStruct((out_dim, padded_batch), x.dtype),
        grid_spec=pltpu.PrefetchScalarGridSpec(
            num_scalar_prefetch=0,
            grid=(steps,),
            in_specs=in_specs,
            out_specs=out_spec,
        ),
        compiler_params=pltpu.CompilerParams(
            dimension_semantics=("parallel",),   # megacore-shardable batch axis
        ),
        cost_estimate=cost,
    )(x, *flat_params)

    return out_t[:, :batch].T                    # back to PyTorch (batch, out_dim)


def init_params(key, layer_sizes):
    """Deterministic init mimicking PyTorch nn.Linear (uniform +-1/sqrt(fan_in)),
    stored directly in PyTorch layout: W (out, in), b (out, 1)."""
    params = []
    for fan_in, fan_out in zip(layer_sizes, layer_sizes[1:]):
        key, kw, kb = jax.random.split(key, 3)
        bound = 1.0 / math.sqrt(fan_in)
        w = jax.random.uniform(kw, (fan_out, fan_in), jnp.float32, -bound, bound)
        b = jax.random.uniform(kb, (fan_out, 1), jnp.float32, -bound, bound)
        params.append((w, b))
    return params


def mlp_reference(x, params):
    h = x
    n = len(params)
    for i, (w, b) in enumerate(params):
        h = h @ w.T + b[:, 0]
        if i < n - 1:
            h = jnp.maximum(h, 0.0)
        else:
            h = jax.nn.sigmoid(h)
    return h


if __name__ == "__main__":
    # NeuralNetwork(layers=[32, 32]) -> dims [3, 32, 32, 1]
    hidden_layers = [32, 32]
    layer_sizes = [3] + hidden_layers + [1]

    key = jax.random.PRNGKey(0)
    key, kx = jax.random.split(key)
    batch = 8
    x = jax.random.normal(kx, (batch, 3), dtype=jnp.float32)

    params = init_params(key, layer_sizes)

    out = mlp_forward(x, params)
    out = jax.block_until_ready(out)

    ref = mlp_reference(x, params)
    assert out.shape == (batch, 1)
    assert jnp.allclose(out, ref, atol=1e-5, rtol=1e-5), "mismatch vs reference"

    print("KERNEL_OK")
</pallas_src>

<mosaic_0001>
module attributes {stable_mosaic.version = 11 : i64} {
  func.func @_mlp_kernel(%arg0: i32, %arg1: memref<128x3xf32, #tpu.memory_space<vmem>>, %arg2: memref<32x3xf32, #tpu.memory_space<vmem>>, %arg3: memref<32x1xf32, #tpu.memory_space<vmem>>, %arg4: memref<32x32xf32, #tpu.memory_space<vmem>>, %arg5: memref<32x1xf32, #tpu.memory_space<vmem>>, %arg6: memref<1x32xf32, #tpu.memory_space<vmem>>, %arg7: memref<1x1xf32, #tpu.memory_space<vmem>>, %arg8: memref<1x128xf32, #tpu.memory_space<vmem>>) attributes {dimension_semantics = [#tpu.dimension_semantics<parallel>], iteration_bounds = array<i64: 2>, scalar_prefetch = 0 : i64, scratch_operands = 0 : i64, tpu.core_type = #tpu.core_type<tc>, window_params = [{transform_indices = @transform_0, window_bounds = array<i64: 128, 3>}, {pipeline_mode = #tpu.pipeline_mode<synchronous>, transform_indices = @transform_1, window_bounds = array<i64: 32, 3>}, {pipeline_mode = #tpu.pipeline_mode<synchronous>, transform_indices = @transform_2, window_bounds = array<i64: 32, 1>}, {pipeline_mode = #tpu.pipeline_mode<synchronous>, transform_indices = @transform_3, window_bounds = array<i64: 32, 32>}, {pipeline_mode = #tpu.pipeline_mode<synchronous>, transform_indices = @transform_4, window_bounds = array<i64: 32, 1>}, {pipeline_mode = #tpu.pipeline_mode<synchronous>, transform_indices = @transform_5, window_bounds = array<i64: 1, 32>}, {pipeline_mode = #tpu.pipeline_mode<synchronous>, transform_indices = @transform_6, window_bounds = array<i64: 1, 1>}, {transform_indices = @transform_7, window_bounds = array<i64: 1, 128>}]} {
    %c0 = arith.constant 0 : index
    %c0_0 = arith.constant 0 : index
    %0 = vector.load %arg2[%c0, %c0_0] : memref<32x3xf32, #tpu.memory_space<vmem>>, vector<32x3xf32>
    %c0_1 = arith.constant 0 : index
    %c0_2 = arith.constant 0 : index
    %1 = vector.load %arg3[%c0_1, %c0_2] : memref<32x1xf32, #tpu.memory_space<vmem>>, vector<32x1xf32>
    %c0_3 = arith.constant 0 : index
    %c0_4 = arith.constant 0 : index
    %2 = vector.load %arg1[%c0_3, %c0_4] : memref<128x3xf32, #tpu.memory_space<vmem>>, vector<128x3xf32>
    %cst = arith.constant dense<0.000000e+00> : vector<32x128xf32>
    %3 = tpu.matmul %0, %2, %cst {dimension_numbers = #tpu.dot_dimension_numbers<[1], [1], [0], [0], [0, 0, 1, 0], [], []>} : vector<32x3xf32>, vector<128x3xf32>, vector<32x128xf32> -> vector<32x128xf32>
    %4 = vector.broadcast %1 : vector<32x1xf32> to vector<32x128xf32>
    %5 = arith.addf %3, %4 : vector<32x128xf32>
    %cst_5 = arith.constant 0.000000e+00 : f32
    %6 = vector.broadcast %cst_5 : f32 to vector<32x128xf32>
    %7 = arith.maximumf %5, %6 : vector<32x128xf32>
    %c0_6 = arith.constant 0 : index
    %c0_7 = arith.constant 0 : index
    %8 = vector.load %arg4[%c0_6, %c0_7] : memref<32x32xf32, #tpu.memory_space<vmem>>, vector<32x32xf32>
    %c0_8 = arith.constant 0 : index
    %c0_9 = arith.constant 0 : index
    %9 = vector.load %arg5[%c0_8, %c0_9] : memref<32x1xf32, #tpu.memory_space<vmem>>, vector<32x1xf32>
    %cst_10 = arith.constant dense<0.000000e+00> : vector<32x128xf32>
    %10 = tpu.matmul %8, %7, %cst_10 {dimension_numbers = #tpu.dot_dimension_numbers<[1], [0], [0], [1], [0, 0, 1, 1], [], []>} : vector<32x32xf32>, vector<32x128xf32>, vector<32x128xf32> -> vector<32x128xf32>
    %11 = vector.broadcast %9 : vector<32x1xf32> to vector<32x128xf32>
    %12 = arith.addf %10, %11 : vector<32x128xf32>
    %cst_11 = arith.constant 0.000000e+00 : f32
    %13 = vector.broadcast %cst_11 : f32 to vector<32x128xf32>
    %14 = arith.maximumf %12, %13 : vector<32x128xf32>
    %c0_12 = arith.constant 0 : index
    %c0_13 = arith.constant 0 : index
    %15 = vector.load %arg6[%c0_12, %c0_13] : memref<1x32xf32, #tpu.memory_space<vmem>>, vector<1x32xf32>
    %c0_14 = arith.constant 0 : index
    %c0_15 = arith.constant 0 : index
    %16 = vector.load %arg7[%c0_14, %c0_15] : memref<1x1xf32, #tpu.memory_space<vmem>>, vector<1x1xf32>
    %cst_16 = arith.constant dense<0.000000e+00> : vector<1x128xf32>
    %17 = tpu.matmul %15, %14, %cst_16 {dimension_numbers = #tpu.dot_dimension_numbers<[1], [0], [0], [1], [0, 0, 1, 1], [], []>} : vector<1x32xf32>, vector<32x128xf32>, vector<1x128xf32> -> vector<1x128xf32>
    %18 = vector.broadcast %16 : vector<1x1xf32> to vector<1x128xf32>
    %19 = arith.addf %17, %18 : vector<1x128xf32>
    %cst_17 = arith.constant 0.000000e+00 : f32
    %20 = vector.broadcast %cst_17 : f32 to vector<1x128xf32>
    %21 = arith.subf %20, %19 : vector<1x128xf32>
    %22 = math.exp %21 : vector<1x128xf32>
    %cst_18 = arith.constant 1.000000e+00 : f32
    %23 = vector.broadcast %cst_18 : f32 to vector<1x128xf32>
    %24 = arith.addf %23, %22 : vector<1x128xf32>
    %25 = tpu.reciprocal %24 : vector<1x128xf32> -> vector<1x128xf32>
    %c0_19 = arith.constant 0 : index
    %c0_20 = arith.constant 0 : index
    %26 = vector.load %arg8[%c0_19, %c0_20] : memref<1x128xf32, #tpu.memory_space<vmem>>, vector<1x128xf32>
    tpu.vector_store %arg8[%c0_19, %c0_20], %25 {strides = array<i32>} : memref<1x128xf32, #tpu.memory_space<vmem>>, vector<1x128xf32>,
    return
  }
  func.func @transform_0(%arg0: i32) -> (i32, i32) {
    %c0_i32 = arith.constant 0 : i32
    %0 = arith.minsi %arg0, %c0_i32 : i32
    %c0_i32_0 = arith.constant 0 : i32
    %c0_i32_1 = arith.constant 0 : i32
    return %0, %c0_i32_0 : i32, i32
  }
  func.func @transform_1(%arg0: i32) -> (i32, i32) {
    %c0_i32 = arith.constant 0 : i32
    %c0_i32_0 = arith.constant 0 : i32
    %c0_i32_1 = arith.constant 0 : i32
    return %c0_i32, %c0_i32_0 : i32, i32
  }
  func.func @transform_2(%arg0: i32) -> (i32, i32) {
    %c0_i32 = arith.constant 0 : i32
    %c0_i32_0 = arith.constant 0 : i32
    %c0_i32_1 = arith.constant 0 : i32
    return %c0_i32, %c0_i32_0 : i32, i32
  }
  func.func @transform_3(%arg0: i32) -> (i32, i32) {
    %c0_i32 = arith.constant 0 : i32
    %c0_i32_0 = arith.constant 0 : i32
    %c0_i32_1 = arith.constant 0 : i32
    return %c0_i32, %c0_i32_0 : i32, i32
  }
  func.func @transform_4(%arg0: i32) -> (i32, i32) {
    %c0_i32 = arith.constant 0 : i32
    %c0_i32_0 = arith.constant 0 : i32
    %c0_i32_1 = arith.constant 0 : i32
    return %c0_i32, %c0_i32_0 : i32, i32
  }
  func.func @transform_5(%arg0: i32) -> (i32, i32) {
    %c0_i32 = arith.constant 0 : i32
    %c0_i32_0 = arith.constant 0 : i32
    %c0_i32_1 = arith.constant 0 : i32
    return %c0_i32, %c0_i32_0 : i32, i32
  }
  func.func @transform_6(%arg0: i32) -> (i32, i32) {
    %c0_i32 = arith.constant 0 : i32
    %c0_i32_0 = arith.constant 0 : i32
    %c0_i32_1 = arith.constant 0 : i32
    return %c0_i32, %c0_i32_0 : i32, i32
  }
  func.func @transform_7(%arg0: i32) -> (i32, i32) {
    %c0_i32 = arith.constant 0 : i32
    %c0_i32_0 = arith.constant 0 : i32
    return %c0_i32, %arg0 : i32, i32
  }
}

</mosaic_0001>

<bundles_post_ra>
// kernel: tpu_custom_call.1
= control target key start
LH: loop header
LB: loop body
LE: loop exit
PB: predicated region body
PF: predicated region fallthrough
CT: control target
= control target key end

     0   :  { %s1355_s0 = inlined_call_operand.vmem [shape: f32[8,3], index: 0, kind: input, shape index: {}]   ;;  %s1356_s1 = inlined_call_operand.vmem [shape: f32[32,3], index: 1, kind: input, shape index: {}]   ;;  %s1357_s2 = inlined_call_operand.vmem [shape: f32[32,1], index: 2, kind: input, shape index: {}]   ;;  %s1358_s3 = inlined_call_operand.vmem [shape: f32[32,32], index: 3, kind: input, shape index: {}]   ;;  %s1359_s4 = inlined_call_operand.vmem [shape: f32[32,1], index: 4, kind: input, shape index: {}]   ;;  %s1360_s5 = inlined_call_operand.vmem [shape: f32[1,32], index: 5, kind: input, shape index: {}]   ;;  %s1361_s6 = inlined_call_operand.<no memory space> [shape: f32[1,1], index: 6, kind: input, shape index: {}]   ;;  %s1362_s7 = inlined_call_operand.hbm [shape: f32[1,256], index: 7, kind: output, shape index: {}]  }
   0x1   :  { %v12_v0 = vstv %s1361_s6 }
   0x2   :  { %13 = vst [vmem:[#allocation2] sm:$0x1] %v12_v0 }
   0x3   :  { %14 = vsyncpa [#allocation4], 0 }
   0x4   :  { %16 = vsyncpa [#allocation4 + $0x1], 0  ;;  %s1139_s26 = smov 0   ;;  %s1141_s27 = smov 0  }
   0x5   :  { %s1143_s28 = smov 0   ;;  %s1145_s29 = smov 0  }
   0x6 LB: > { %s1160_s6 = sadd.s32 4294967295, %s1089_s29   ;;  %s786_s30 = sadd.s32 4294967294, %s1089_s29   ;;  %s1089_s29 = sphi %s1145_s29, %s1370_s29   ;;  %s1085_s28 = sphi %s1143_s28, %s1369_s28   ;;  %s1081_s27 = sphi %s1141_s27, %s1368_s27   ;;  %s1077_s26 = sphi %s1139_s26, %s1367_s26  }
   0x7   : > { %s1164_s8 = sadd.s32 1, %s1089_s29   ;;  %s185_s9 = sadd.s32 1, %s1085_s28 }
   0x8   : > { %s182_s10 = ssub.s32 %s1089_s29, %s1164_s8  ;;  %p195_p0 = scmp.ne.s32.totalorder %s1085_s28, %s1081_s27 }
   0x9   : > { %p183_p1 = scmp.eq.s32.totalorder %s182_s10, 0  ;;  %p196_p2 = scmp.eq.s32.totalorder %s1160_s6, 1 }
   0xa   : > { %p201_p3 = scmp.ne.s32.totalorder %s1081_s27, %s1077_s26  ;;  %p202_p4 = scmp.eq.s32.totalorder %s786_s30, 1 }
   0xb   : > { %s1175_s11 = scalar_select %p183_p1, %s1085_s28, %s185_s9  }
   0xc   : > { %p1177_p5 = por %p196_p2, %p195_p0  ;;  %p1181_p6 = por %p202_p4, %p201_p3 }
   0xd   : > { %p789_p7 = scmp.ge.s32.totalorder %s1089_s29, 1  ;;  %p255_p8 = scmp.lt.s32.totalorder %s1089_s29, 3 }
   0xf   : > { %p256_p9 = pnand %p789_p7, %p255_p8 }
  0x10   : > { %p290_p10 = scmp.lt.s32.totalorder (!%p256_p9), %s1160_s6, 0  ;;  %vm348_vm0 = vcmask (!%p256_p9), 23552   ;;  %v304_v1 = vld [vmem:[%s1356_s1] sm:$0xff] (!%p256_p9)  ;;  %v1091_v2 = vmov (!%p256_p9), 0   ;;  %v310_v4 = vld [vmem:[%s1357_s2 + $0x10] sm:$0xff] (!%p256_p9)  ;;  %v309_v5 = vld [vmem:[%s1357_s2 + $0x8] sm:$0xff] (!%p256_p9) }
  0x11   : > { %259 = sbr.rel (%p256_p9) target bundleno = 808 (0x328), region = 48  ;;  %885 = vmatprep.mubr.msk.f32.mxu0 (!%p256_p9), %vm348_vm0, %v304_v1  ;;  %1021 = vset.pattern.permute.xlu0 (!%p256_p9), %v1091_v2  ;;  %v308_v3 = vld [vmem:[%s1357_s2] sm:$0xff] (!%p256_p9)  ;;  %v311_v6 = vld [vmem:[%s1357_s2 + $0x18] sm:$0xff] (!%p256_p9)  ;;  %v503_v8 = vld [vmem:[%s1359_s4 + $0x8] sm:$0xff] (!%p256_p9)  ;;  %vm526_vm2 = vcmask (!%p256_p9), 261120   ;;  %v1092_v62 = vmov (!%p256_p9), 0.0|0.0  }
  0x12   : > { %330 = vperm.xlu0 (!%p256_p9), %1021, %v308_v3   ;;  %1022 = vset.pattern.permute.xlu1 (!%p256_p9), %v1091_v2  ;;  %v502_v7 = vld [vmem:[%s1359_s4] sm:$0xff] (!%p256_p9)  ;;  %vm1218_vm1 = vmpackc.low (!%p256_p9), %vm348_vm0, %vm348_vm0  ;;  %v504_v10 = vld [vmem:[%s1359_s4 + $0x10] sm:$0xff] (!%p256_p9)  ;;  %vm1093_vm3 = vmmov (!%p256_p9), 0   ;;  %v1094_v63 = vmov (!%p256_p9), 0.0   ;;  %s288_s24 = sand.u32 (!%p256_p9), 1, %s1081_s27   ;;  %s817_s25 = sshll.u32 (!%p256_p9), %s1160_s6, 4 }
  0x13   : > { %340 = vperm.xlu1 (!%p256_p9), %1022, %v310_v4   ;;  %v505_v16 = vld [vmem:[%s1359_s4 + $0x18] sm:$0xff] (!%p256_p9)  ;;  %v629_v18 = vld [vmem:[#allocation2] sm:$0x1] (!%p256_p9)  ;;  %v305_v37 = vld [vmem:[%s1356_s1 + $0x8] sm:$0xff] (!%p256_p9)  ;;  %s289_s30 = scalar_lea.vmem (!%p256_p9), [#allocation3], %s288_s24  ;;  %s719_s16 = scalar_lea.sflag (!%p256_p9), [#allocation4], %s288_s24 }
  0x14   : > { %v306_v38 = vld [vmem:[%s1356_s1 + $0x10] sm:$0xff] (!%p256_p9)  ;;  %v307_v39 = vld [vmem:[%s1356_s1 + $0x18] sm:$0xff] (!%p256_p9)  ;;  %v498_v40 = vld [vmem:[%s1358_s3] sm:$0xff] (!%p256_p9)  ;;  %s731_s9 = sshll.u32 (!%p256_p9), %s289_s30, 4  ;;  %s1315_s9 = int_to_ptr.vmem [resolvable:$true] %s731_s9 }
  0x15   : > { %899 = vmatprep.mubr.msk.f32.mxu1 (!%p256_p9), %vm526_vm2, %v498_v40  ;;  %v499_v59 = vld [vmem:[%s1358_s3 + $0x8] sm:$0xff] (!%p256_p9)  ;;  %v500_v60 = vld [vmem:[%s1358_s3 + $0x10] sm:$0xff] (!%p256_p9)  ;;  %v501_v61 = vld [vmem:[%s1358_s3 + $0x18] sm:$0xff] (!%p256_p9)  ;;  %s1027_s17 = scalar_lea.vmem (!%p256_p9), %s1315_s9, 16 }
  0x16   : > { %335 = vperm.xlu0 (!%p256_p9), %1021, %v309_v5   ;;  %p1028_p12 = scmp.ne.s32.totalorder (!%p256_p9), %s1315_s9, %s1027_s17 }
  0x17   : > { %345 = vperm.xlu1 (!%p256_p9), %1022, %v311_v6  }
  0x18   : > { %s291_s18 = scalar_select %p290_p10, %s1160_s6, 0 }
  0x19   : > { %p1029_p13 = pnand %p1028_p12, %p1177_p5  ;;  %s1095_s6 = smov [#allocation3]  }
  0x1a   : > { %s790_s23 = sshll.u32 %s291_s18, 4  ;;  %508 = vperm.xlu0 %1021, %v502_v7  }
  0x1b   : > { %p295_p11 = scmp.lt.s32.totalorder %s790_s23, 0  ;;  %513 = vperm.xlu1 %1022, %v503_v8   ;;  %p1030_p0 = pneg %p1029_p13 }
  0x1d   : > { %s1372_s23 = smov (!%p295_p11, %s790_s23), 0 }
  0x1e   : > { %s791_s15 = sshll.u32 %s1372_s23, 3  ;;  %518 = vperm.xlu0 %1021, %v504_v10  }
  0x1f   : > { %s1214_s18 = scalar_lea.vmem %s1355_s0, %s791_s15  ;;  %523 = vperm.xlu1 %1022, %v505_v16   ;;  %s1313_s15 = scalar_lea.hbm %s1362_s7, %s817_s25 }
  0x20   : > { %v312_v11 = vld [vmem:[%s1214_s18] sm:$0xff]  ;;  %v313_v12 = vld [vmem:[%s1214_s18 + $0x8] sm:$0xff]  ;;  %v314_v13 = vld [vmem:[%s1214_s18 + $0x10] sm:$0xff] }
  0x21   : > { %v916_v14 = vpack.c.bf16 %v313_v12, %v312_v11  ;;  %v315_v15 = vld [vmem:[%s1214_s18 + $0x18] sm:$0xff]  ;;  %v316_v19 = vld [vmem:[%s1214_s18 + $0x20] sm:$0xff]  ;;  %v317_v20 = vld [vmem:[%s1214_s18 + $0x28] sm:$0xff] }
  0x22   : > { %v922_v17 = vpack.c.bf16 %v315_v15, %v314_v13  ;;  %632 = vperm.xlu0 %1021, %v629_v18   ;;  %v928_v21 = vpack.c.bf16 %v317_v20, %v316_v19  ;;  %v318_v22 = vld [vmem:[%s1214_s18 + $0x30] sm:$0xff]  ;;  %v319_v23 = vld [vmem:[%s1214_s18 + $0x38] sm:$0xff]  ;;  %v320_v25 = vld [vmem:[%s1214_s18 + $0x40] sm:$0xff]  ;;  %v635_v19 = vlaneseq }
  0x23   : > { %918 = vmatprep.subr.msk.bf16.mxu0 %vm1218_vm1, %v916_v14  ;;  %v934_v24 = vpack.c.bf16 %v319_v23, %v318_v22  ;;  %v321_v26 = vld [vmem:[%s1214_s18 + $0x48] sm:$0xff]  ;;  %v322_v28 = vld [vmem:[%s1214_s18 + $0x50] sm:$0xff]  ;;  %v323_v29 = vld [vmem:[%s1214_s18 + $0x58] sm:$0xff] }
  0x24   : > { %921 = vmatpush3.bf16.xpose.msk.msra.mxu0 %vm1218_vm1, %v916_v14  ;;  %v940_v27 = vpack.c.bf16 %v321_v26, %v320_v25  ;;  %v946_v30 = vpack.c.bf16 %v323_v29, %v322_v28  ;;  %v324_v31 = vld [vmem:[%s1214_s18 + $0x60] sm:$0xff]  ;;  %v325_v32 = vld [vmem:[%s1214_s18 + $0x68] sm:$0xff]  ;;  %v326_v34 = vld [vmem:[%s1214_s18 + $0x70] sm:$0xff]  ;;  %v636_v20 = vshrl.u32 %v635_v19, 7 }
  0x25   : > { %924 = vmatprep.subr.msk.bf16.mxu0 %vm1218_vm1, %v922_v17  ;;  %v952_v33 = vpack.c.bf16 %v325_v32, %v324_v31  ;;  %v327_v35 = vld [vmem:[%s1214_s18 + $0x78] sm:$0xff]  ;;  %v628_v18 = vld [vmem:[%s1360_s5] sm:$0x1]  ;;  %s1031_s18 = sshll.u32 %s1095_s6, 4  ;;  %s1032_s18 = int_to_ptr.vmem [resolvable:$false] %s1031_s18 }
  0x26   : > { %v958_v36 = vpack.c.bf16 %v327_v35, %v326_v34  ;;  %s1033_s19 = scalar_lea.vmem %s1032_s18, 32  ;;  %p1034_p1 = scmp.lt.s32.totalorder %s1315_s9, %s1032_s18 }
  0x27   : > { %p1035_p2 = scmp.lt.s32.totalorder %s1033_s19, %s1027_s17 }
  0x29   : > { %p1036_p3 = por %p1035_p2, %p1034_p1 }
  0x2b   : > { %p1037_p4 = pnand %p1036_p3, %p1030_p0 }
  0x2c   : > { %927 = vmatpush3.bf16.xpose.msk.msra.mxu0 %vm1218_vm1, %v922_v17 }
  0x2d   : > { %930 = vmatprep.subr.msk.bf16.mxu0 %vm1218_vm1, %v928_v21 }
  0x34   : > { %933 = vmatpush3.bf16.xpose.msk.msra.mxu0 %vm1218_vm1, %v928_v21  ;;  %v637_v21 = vsub.s32 0, %v636_v20 }
  0x35   : > { %936 = vmatprep.subr.msk.bf16.mxu0 %vm1218_vm1, %v934_v24 }
  0x3c   : > { %939 = vmatpush3.bf16.xpose.msk.msra.mxu0 %vm1218_vm1, %v934_v24 }
  0x3d   : > { %942 = vmatprep.subr.msk.bf16.mxu0 %vm1218_vm1, %v940_v27 }
  0x44   : > { %945 = vmatpush3.bf16.xpose.msk.msra.mxu0 %vm1218_vm1, %v940_v27 }
  0x45   : > { %948 = vmatprep.subr.msk.bf16.mxu0 %vm1218_vm1, %v946_v30 }
  0x4c   : > { %951 = vmatpush3.bf16.xpose.msk.msra.mxu0 %vm1218_vm1, %v946_v30 }
  0x4d   : > { %954 = vmatprep.subr.msk.bf16.mxu0 %vm1218_vm1, %v952_v33 }
  0x54   : > { %957 = vmatpush3.bf16.xpose.msk.msra.mxu0 %vm1218_vm1, %v952_v33 }
  0x55   : > { %960 = vmatprep.subr.msk.bf16.mxu0 %vm1218_vm1, %v958_v36 }
  0x5c   : > { %963 = vmatpush3.bf16.xpose.msk.msra.mxu0 %vm1218_vm1, %v958_v36 }
  0x63   : > { %886 = vmatmul.mubr.msk.f32.vlgmr.msra.gmra.mrb[0].mxu0 %vm348_vm0, %v305_v37 }
  0x64   : > { %888 = vmatprep.mubr.msk.f32.mxu0 %vm348_vm0, %v306_v38 }
  0x67   : > { %889 = vmatmul.mubr.msk.f32.gmra.mrb[2].mxu0 %vm348_vm0, %v307_v39 }
  0x91   : > { %v331_v41 = vpop.permute.xlu0 %330 }
  0x92   : > { %v341_v42 = vpop.permute.xlu1 %340 }
  0x95   : > { %v336_v43 = vpop.permute.xlu0 %335 }
  0x96   : > { %v346_v49 = vpop.permute.xlu1 %345 }
  0x99   : > { %v509_v1 = vpop.permute.xlu0 %508 }
  0x9a   : > { %v514_v0 = vpop.permute.xlu1 %513 }
  0x9d   : > { %v519_v10 = vpop.permute.xlu0 %518 }
  0x9e   : > { %v524_v7 = vpop.permute.xlu1 %523 }
  0xa1   : > { %v633_v22 = vpop.permute.xlu0 %632 }
  0xa2   : > { %v638_v23 = vrot.slane %v633_v22, %v637_v21 }
 0x136   : > { %v887_v44 = vpop.f32.mrb[0].mxu0 }
 0x137   : > { %v481_v45 = vadd.f32 %v887_v44, %v336_v43  ;;  %v475_v46 = vpop.f32.mrb[1].mxu0 }
 0x138   : > { %v476_v47 = vadd.f32 %v475_v46, %v331_v41 }
 0x139   : > { %v495_v48 = vmax.f32 %v481_v45, 0.0 }
 0x13a   : > { %v494_v50 = vmax.f32 %v476_v47, 0.0  ;;  %v890_v51 = vpop.f32.mrb[2].mxu0 }
 0x13b   : > { %v491_v52 = vadd.f32 %v890_v51, %v346_v49  ;;  %v485_v53 = vpop.f32.mrb[3].mxu0 }
 0x13c   : > { %v486_v54 = vadd.f32 %v485_v53, %v341_v42  ;;  %v964_v55 = vpack.c.bf16 %v495_v48, %v494_v50 }
 0x13d   : > { %v497_v56 = vmax.f32 %v491_v52, 0.0 }
 0x13e   : > { %v496_v57 = vmax.f32 %v486_v54, 0.0  ;;  %965 = vmatprep.subr.bf16.mxu1 %v964_v55 }
 0x13f   : > { %967 = vmatpush3.bf16.msra.mxu1 %v964_v55 }
 0x140   : > { %v968_v58 = vpack.c.bf16 %v497_v56, %v496_v57 }
 0x142   : > { %969 = vmatprep.subr.bf16.mxu1 %v968_v58 }
 0x143   : > { %971 = vmatpush3.bf16.msra.mxu1 %v968_v58 }
 0x144   : > { %972 = vmatprep.subr.bf16.mxu1 %v1092_v62 }
 0x146   : > { %900 = vmatmul.mubr.msk.f32.vlgmr.msra.gmra.mrb[0].mxu1 %vm526_vm2, %v499_v59 }
 0x147   : > { %902 = vmatprep.mubr.msk.f32.mxu1 %vm526_vm2, %v500_v60 }
 0x14a   : > { %903 = vmatmul.mubr.msk.f32.gmra.mrb[2].mxu1 %vm526_vm2, %v501_v61 }
 0x14b   : > { %913 = vmatprep.mubr.msk.f32.mxu1 %vm1093_vm3, %v1094_v63 }
 0x219   : > { %v901_v2 = vpop.f32.mrb[0].mxu1 }
 0x21a   : > { %v611_v3 = vadd.f32 %v901_v2, %v514_v0  ;;  %v605_v4 = vpop.f32.mrb[1].mxu1 }
 0x21b   : > { %v606_v5 = vadd.f32 %v605_v4, %v509_v1 }
 0x21c   : > { %v625_v6 = vmax.f32 %v611_v3, 0.0 }
 0x21d   : > { %v624_v8 = vmax.f32 %v606_v5, 0.0  ;;  %v904_v9 = vpop.f32.mrb[2].mxu1 }
 0x21e   : > { %v621_v11 = vadd.f32 %v904_v9, %v524_v7  ;;  %v615_v12 = vpop.f32.mrb[3].mxu1 }
 0x21f   : > { %v973_v13 = vpack.c.bf16 %v625_v6, %v624_v8  ;;  %v616_v14 = vadd.f32 %v615_v12, %v519_v10 }
 0x220   : > { %v627_v15 = vmax.f32 %v621_v11, 0.0 }
 0x221   : > { %v626_v16 = vmax.f32 %v616_v14, 0.0  ;;  %974 = vmatpush3.bf16.msra.mxu1 %v973_v13 }
 0x222   : > { %975 = vmatprep.subr.bf16.mxu1 %v1092_v62 }
 0x223   : > { %v976_v17 = vpack.c.bf16 %v627_v15, %v626_v16 }
 0x225   : > { %977 = vmatpush3.bf16.msra.mxu1 %v976_v17 }
 0x228   : > { %914 = vmatmul.mubr.msk.f32.vlgmr.msra.gmra.mrb[4].mxu1 %vm526_vm2, %v628_v18 }
 0x2fb   : > { %v708_v24 = vpop.f32.mrb[4].mxu1 }
 0x2fc   : > { %v709_v25 = vadd.f32 %v708_v24, %v638_v23  ;;  %v915_v26 = vpop.f32.mrb[5].mxu1 }
 0x2fe   : > { %v712_v27 = vsub.f32 0.0, %v709_v25 }
 0x300   : > { %v713_v28 = vmul.f32 1.442695, %v712_v27 }
 0x302   : > { %1023 = vpow2.f32 %v713_v28 }
 0x30c   : > { %v1024_v29 = vpop.eup %1023 }
 0x30d   : > { %v715_v30 = vadd.f32 1.0, %v1024_v29 }
 0x30f   : > { %1025 = vrcp.f32 %v715_v30 }
 0x319   : > { %v1026_v31 = vpop.eup %1025 }
 0x31a   : > { %717 = vst [vmem:[%s289_s30] sm:$0x1] %v1026_v31 }
 0x31b   : > { %1040 = shalt.err (!%p1037_p4)
}
 0x31c   : > { %s1041_s20 = scalar_lea.hbm %s1313_s15, 16  ;;  %s1045_s23 = scalar_lea.hbm %s1362_s7, 32 }
 0x31d   : > { %p1042_p7 = scmp.ne.s32.totalorder %s1313_s15, %s1041_s20  ;;  %p1046_p10 = scmp.lt.u32.totalorder %s1313_s15, %s1362_s7 }
 0x31e   : > { %p1047_p11 = scmp.lt.u32.totalorder %s1045_s23, %s1041_s20  ;;  %p1049_p13 = scmp.lt.u32.totalorder %s1041_s20, %s1313_s15 }
 0x31f   : > { %p1043_p8 = pnand %p1042_p7, %p1177_p5 }
 0x320   : > { %p1048_p12 = por %p1047_p11, %p1046_p10 }
 0x321   : > { %p1044_p9 = pneg %p1043_p8 }
 0x322   : > { %p1050_p0 = por %p1049_p13, %p1048_p12 }
 0x324   : > { %p1051_p1 = pnand %p1050_p0, %p1044_p9 }
 0x326   : > { %1054 = shalt.err (!%p1051_p1)
}
 0x327   : > { %978 = dma.vmem_to_hbm [thread:$0]  (%p1177_p5), %s1315_s9, 16, %s1313_s15, %s719_s16  }
 0x328 PF: > { %p984_p2 = scmp.ge.s32.totalorder %s1089_s29, 2  ;;  %s743_s30 = sand.u32 1, %s1077_s26  }
 0x329   : > { %s744_s10 = scalar_lea.sflag [#allocation4], %s743_s30 }
 0x32a   : > { %p981_p3 = pnand %p984_p2, %p1181_p6 }
 0x32c   : > { %1072 = dma.done.wait (!%p981_p3), %s744_s10, 16  }
 0x32d   : > { %1074 = vsyncadd (!%p981_p3), %s744_s10, 4294967280  ;;  %p19_p4 = scmp.ge.s32.totalorder %s1164_s8, 4   ;;  %s1367_s26 = smov %s1081_s27 }
 0x32e   : > { %s1368_s27 = smov %s1085_s28  ;;  %s1369_s28 = smov %s1175_s11 }
 0x32f   : > { %s1370_s29 = smov %s1164_s8  ;;  %21 = sbr.rel (!%p19_p4) target bundleno = 6 (0x6), region = 83 }
 0x336   :  { %748 = vsyncpa [#allocation4], 1 }
 0x337   :  { %750 = vsyncpa [#allocation4 + $0x1], 1 }

</bundles_post_ra>
